<compile_context>
chip_gen: v7x
topology: tpu7x:2x2x1
jax: 0.10.0
libtpu: 0.0.40
codegen_flags: <defaults>
</compile_context>

<pallas_src>
import jax
import jax.numpy as jnp
from jax.experimental import pallas as pl
from jax.experimental.pallas import tpu as pltpu

IN_FEATURES = 8
OUT_FEATURES = 4
LANE_PAD = 128     # lane-dense padded output width (multiple of 128)
ROW_TILE = 256     # rows per grid step when the call is batched


def linear_add_kernel(other_ref, x_ref, w_ref, b_ref, o_ref):
    """o = x @ w + b + other  (one row tile).

    other_ref: (1, 1)        f32 SMEM  -- the `other` forward argument
    x_ref:     (TM, IN)      f32 VMEM  -- activation row tile
    w_ref:     (IN, LANE)    f32 VMEM  -- weight.T, zero-padded on lane axis
    b_ref:     (1, LANE)     f32 VMEM  -- bias, zero-padded on lane axis
    o_ref:     (TM, LANE)    f32 VMEM  -- lane-dense output slab
    """
    y = jnp.dot(x_ref[...], w_ref[...], preferred_element_type=jnp.float32)
    # Bias broadcast + scalar `other` are VPU adds (hidden under DMA/MXU slack).
    o_ref[...] = (y + b_ref[...] + other_ref[0, 0]).astype(o_ref.dtype)


def prepare_params(weight, bias, lane_pad=LANE_PAD):
    """One-time parameter prep (outside the per-call path).

    weight: (OUT, IN) as stored by torch.nn.Linear; bias: (OUT,).
    Returns (w_pad, b_pad) with the output axis transposed to last and
    zero-padded to a lane-dense width.
    """
    out_f, in_f = weight.shape
    w_t = weight.T.astype(jnp.float32)                       # (IN, OUT)
    w_pad = jnp.zeros((in_f, lane_pad), jnp.float32).at[:, :out_f].set(w_t)
    b_pad = jnp.zeros((1, lane_pad), jnp.float32).at[0, :out_f].set(
        bias.astype(jnp.float32))
    return w_pad, b_pad


def linear_add(x, w_pad, b_pad, other, out_features=OUT_FEATURES):
    """Forward of Model: Linear(IN, OUT)(x) + other.   x: (B, IN) f32."""
    B, in_f = x.shape
    lane_pad = w_pad.shape[1]

    # Row tiling: single full block for small B; 256-row tiles (parallel grid)
    # when batched.
    tm = ROW_TILE if (B >= ROW_TILE and B % ROW_TILE == 0) else B
    grid = (B // tm,)

    other_arr = jnp.full((1, 1), other, dtype=jnp.float32)

    cost = pl.CostEstimate(
        flops=2 * B * in_f * lane_pad,
        transcendentals=0,
        bytes_accessed=(B * in_f + in_f * lane_pad + lane_pad + B * lane_pad) * 4,
    )

    out_pad = pl.pallas_call(
        linear_add_kernel,
        out_shape=jax.ShapeDtypeStruct((B, lane_pad), jnp.float32),
        grid=grid,
        in_specs=[
            pl.BlockSpec(memory_space=pltpu.MemorySpace.SMEM),   # other (1,1)
            pl.BlockSpec((tm, in_f), lambda i: (i, 0)),          # x row tile
            pl.BlockSpec((in_f, lane_pad), lambda i: (0, 0)),    # padded W^T
            pl.BlockSpec((1, lane_pad), lambda i: (0, 0)),       # padded bias
        ],
        out_specs=pl.BlockSpec((tm, lane_pad), lambda i: (i, 0)),
        compiler_params=pltpu.CompilerParams(
            dimension_semantics=("parallel",)),
        cost_estimate=cost,
    )(other_arr, x, w_pad, b_pad)

    # Slice the lane-dense slab back to the true output width.
    return out_pad[:, :out_features]


if __name__ == "__main__":
    key = jax.random.PRNGKey(0)
    kx, kw, kb = jax.random.split(key, 3)

    B, IN, OUT = 1, IN_FEATURES, OUT_FEATURES

    # Input like torch.randn(1, 8)
    x1 = jax.random.normal(kx, (B, IN), dtype=jnp.float32)

    # Deterministic Linear(8, 4) params (PyTorch-style uniform init, bound 1/sqrt(IN))
    bound = 1.0 / (IN ** 0.5)
    weight = jax.random.uniform(kw, (OUT, IN), minval=-bound, maxval=bound,
                                dtype=jnp.float32)   # torch stores (out, in)
    bias = jax.random.uniform(kb, (OUT,), minval=-bound, maxval=bound,
                              dtype=jnp.float32)

    other = 1.0

    # One-time parameter prep (lane-dense padding) outside the per-call path.
    w_pad, b_pad = prepare_params(weight, bias)

    # Module-consistent shape: (1, 8) -> (1, 4)
    out = linear_add(x1, w_pad, b_pad, other)
    out = jax.block_until_ready(out)

    ref = x1 @ weight.T + bias + other
    assert out.shape == (B, OUT)
    assert jnp.allclose(out, ref, atol=1e-5, rtol=1e-5)

    # Also exercise the batched (gridded, "parallel") path once.
    xb = jax.random.normal(kx, (512, IN), dtype=jnp.float32)
    outb = jax.block_until_ready(linear_add(xb, w_pad, b_pad, other))
    refb = xb @ weight.T + bias + other
    assert outb.shape == (512, OUT)
    assert jnp.allclose(outb, refb, atol=1e-4, rtol=1e-4)

    print("KERNEL_OK")
</pallas_src>

<mosaic_0001>
module attributes {stable_mosaic.version = 11 : i64} {
  func.func @linear_add_kernel(%arg0: i32, %arg1: memref<1x1xf32, #tpu.memory_space<smem>>, %arg2: memref<1x8xf32, #tpu.memory_space<vmem>>, %arg3: memref<8x128xf32, #tpu.memory_space<vmem>>, %arg4: memref<1x128xf32, #tpu.memory_space<vmem>>, %arg5: memref<1x128xf32, #tpu.memory_space<vmem>>) attributes {dimension_semantics = [#tpu.dimension_semantics<parallel>], iteration_bounds = array<i64: 1>, scalar_prefetch = 0 : i64, scratch_operands = 0 : i64, tpu.core_type = #tpu.core_type<tc>, window_params = [{transform_indices = @transform_0, window_bounds = array<i64: 1, 1>}, {transform_indices = @transform_1, window_bounds = array<i64: 1, 8>}, {pipeline_mode = #tpu.pipeline_mode<synchronous>, transform_indices = @transform_2, window_bounds = array<i64: 8, 128>}, {pipeline_mode = #tpu.pipeline_mode<synchronous>, transform_indices = @transform_3, window_bounds = array<i64: 1, 128>}, {transform_indices = @transform_4, window_bounds = array<i64: 1, 128>}]} {
    %c0 = arith.constant 0 : index
    %c0_0 = arith.constant 0 : index
    %0 = vector.load %arg2[%c0, %c0_0] : memref<1x8xf32, #tpu.memory_space<vmem>>, vector<1x8xf32>
    %c0_1 = arith.constant 0 : index
    %c0_2 = arith.constant 0 : index
    %1 = vector.load %arg3[%c0_1, %c0_2] : memref<8x128xf32, #tpu.memory_space<vmem>>, vector<8x128xf32>
    %cst = arith.constant dense<0.000000e+00> : vector<1x128xf32>
    %2 = tpu.matmul %0, %1, %cst {dimension_numbers = #tpu.dot_dimension_numbers<[1], [0], [0], [1], [0, 0, 1, 1], [], []>} : vector<1x8xf32>, vector<8x128xf32>, vector<1x128xf32> -> vector<1x128xf32>
    %c0_3 = arith.constant 0 : index
    %c0_4 = arith.constant 0 : index
    %3 = vector.load %arg4[%c0_3, %c0_4] : memref<1x128xf32, #tpu.memory_space<vmem>>, vector<1x128xf32>
    %4 = arith.addf %2, %3 : vector<1x128xf32>
    %c0_5 = arith.constant 0 : index
    %c0_6 = arith.constant 0 : index
    %5 = memref.load %arg1[%c0_5, %c0_6] : memref<1x1xf32, #tpu.memory_space<smem>>
    %6 = vector.broadcast %5 : f32 to vector<1x128xf32>
    %7 = arith.addf %4, %6 : vector<1x128xf32>
    %c0_7 = arith.constant 0 : index
    %c0_8 = arith.constant 0 : index
    %8 = vector.load %arg5[%c0_7, %c0_8] : memref<1x128xf32, #tpu.memory_space<vmem>>, vector<1x128xf32>
    tpu.vector_store %arg5[%c0_7, %c0_8], %7 {strides = array<i32>} : memref<1x128xf32, #tpu.memory_space<vmem>>, vector<1x128xf32>,
    return
  }
  func.func @transform_0(%arg0: i32) -> (i32, i32) {
    %c0_i32 = arith.constant 0 : i32
    %c0_i32_0 = arith.constant 0 : i32
    %c0_i32_1 = arith.constant 0 : i32
    return %c0_i32, %c0_i32_0 : i32, i32
  }
  func.func @transform_1(%arg0: i32) -> (i32, i32) {
    %c0_i32 = arith.constant 0 : i32
    %c0_i32_0 = arith.constant 0 : i32
    return %arg0, %c0_i32 : i32, i32
  }
  func.func @transform_2(%arg0: i32) -> (i32, i32) {
    %c0_i32 = arith.constant 0 : i32
    %c0_i32_0 = arith.constant 0 : i32
    %c0_i32_1 = arith.constant 0 : i32
    return %c0_i32, %c0_i32_0 : i32, i32
  }
  func.func @transform_3(%arg0: i32) -> (i32, i32) {
    %c0_i32 = arith.constant 0 : i32
    %c0_i32_0 = arith.constant 0 : i32
    %c0_i32_1 = arith.constant 0 : i32
    return %c0_i32, %c0_i32_0 : i32, i32
  }
  func.func @transform_4(%arg0: i32) -> (i32, i32) {
    %c0_i32 = arith.constant 0 : i32
    %c0_i32_0 = arith.constant 0 : i32
    return %arg0, %c0_i32 : i32, i32
  }
}

</mosaic_0001>

<bundles_post_ra>
// kernel: tpu_custom_call.1
= control target key start
LH: loop header
LB: loop body
LE: loop exit
PB: predicated region body
PF: predicated region fallthrough
CT: control target
= control target key end

     0   :  { %10 = vsyncpa [#allocation4], 0  ;;  %s249_s0 = inlined_call_operand.<no memory space> [shape: f32[1,1], index: 0, kind: input, shape index: {}]   ;;  %s250_s1 = inlined_call_operand.vmem [shape: f32[1,8], index: 1, kind: input, shape index: {}]   ;;  %s251_s2 = inlined_call_operand.hbm [shape: f32[8,128], index: 2, kind: input, shape index: {}]   ;;  %s252_s3 = inlined_call_operand.vmem [shape: f32[1,128], index: 3, kind: input, shape index: {}]   ;;  %s253_s4 = inlined_call_operand.hbm [shape: f32[1,128], index: 4, kind: output, shape index: {}]  }
   0x1   :  { %11 = vsyncpa [#allocation5], 0  ;;  %s187_s15 = smov [#allocation3]   ;;  %s139_s19 = scalar_lea.hbm %s251_s2, 128 }
   0x2   :  { %s22_s16 = sshll.u32 %s187_s15, 4  ;;  %p140_p0 = scmp.ne.s32.totalorder %s251_s2, %s139_s19  ;;  %s23_s16 = int_to_ptr.vmem [resolvable:$true] %s22_s16 }
   0x3   :  { %p143_p1 = scmp.lt.u32.totalorder %s139_s19, %s251_s2 }
   0x5   :  { %p145_p2 = pnand %p143_p1, %p140_p0 }
   0x7   :  { %148 = shalt.err (!%p145_p2)
}
   0x8   :  { %s149_s24 = scalar_lea.vmem %s23_s16, 128  ;;  %p154_p4 = scmp.lt.s32.totalorder %s23_s16, %s23_s16 }
   0x9   :  { %p150_p3 = scmp.ne.s32.totalorder %s23_s16, %s149_s24  ;;  %p155_p5 = scmp.lt.s32.totalorder %s149_s24, %s149_s24 }
   0xb   :  { %p156_p6 = por %p155_p5, %p154_p4 }
   0xd   :  { %p157_p7 = pnand %p156_p6, %p150_p3 }
   0xf   :  { %160 = shalt.err (!%p157_p7)
}
  0x10   :  { %25 = dma.hbm_to_vmem [thread:$0]  %s251_s2, 128, %s23_s16, [#allocation4]  }
  0x11   :  { %183 = dma.done.wait [#allocation4], 128  }
  0x12   :  { %184 = vsyncadd [#allocation4], 4294967168  ;;  %v188_v0 = vmov 0.0   ;;  %vm189_vm0 = vmmov 0   ;;  %vm34_vm1 = vcmask 64512   ;;  %v32_v1 = vld [vmem:[#allocation3] sm:$0xff]  ;;  %v109_v5 = vstv %s249_s0 }
  0x13   :  { %130 = vmatprep.subr.mxu0 %v188_v0  ;;  %132 = vmatprep.mubr.msk.f32.mxu0 %vm189_vm0, %v188_v0  ;;  %v31_v2 = vld [vmem:[%s250_s1] sm:$0x1]  ;;  %s190_s6 = smov [#allocation6]  }
  0x14   :  { %131 = vmatpush3.msra.mxu0 %v32_v1  ;;  %v33_v3 = vld [vmem:[%s252_s3] sm:$0x1]  ;;  %s118_s7 = sshll.u32 %s190_s6, 4  ;;  %s119_s7 = int_to_ptr.vmem [resolvable:$true] %s118_s7 }
  0x15   :  { %133 = vmatmul.mubr.msk.f32.vlgmr.msra.gmra.mrb[0].mxu0 %vm34_vm1, %v31_v2  ;;  %s161_s8 = scalar_lea.vmem %s119_s7, 16  ;;  %s165_s1 = scalar_lea.vmem %s119_s7, 32 }
  0x16   :  { %p162_p8 = scmp.ne.s32.totalorder %s119_s7, %s161_s8  ;;  %p166_p9 = scmp.lt.s32.totalorder %s119_s7, %s119_s7 }
  0x17   :  { %p167_p10 = scmp.lt.s32.totalorder %s165_s1, %s161_s8 }
  0x19   :  { %p168_p11 = por %p167_p10, %p166_p9 }
  0x1b   :  { %p169_p12 = pnand %p168_p11, %p162_p8 }
  0xe8   :  { %v104_v4 = vpop.f32.mrb[0].mxu0 }
  0xe9   :  { %v105_v6 = vadd.f32 %v104_v4, %v33_v3  ;;  %v134_v7 = vpop.f32.mrb[1].mxu0 }
  0xeb   :  { %v110_v8 = vadd.f32 %v109_v5, %v105_v6 }
  0xed   :  { %111 = vst [vmem:[#allocation6] sm:$0x1] %v110_v8 }
  0xee   :  { %172 = shalt.err (!%p169_p12)
}
  0xef   :  { %s173_s10 = scalar_lea.hbm %s253_s4, 16 }
  0xf0   :  { %p174_p13 = scmp.ne.s32.totalorder %s253_s4, %s173_s10  ;;  %p177_p0 = scmp.lt.u32.totalorder %s173_s10, %s253_s4 }
  0xf2   :  { %p179_p1 = pnand %p177_p0, %p174_p13 }
  0xf4   :  { %182 = shalt.err (!%p179_p1)
}
  0xf5   :  { %121 = dma.vmem_to_hbm [thread:$0]  %s119_s7, 16, %s253_s4, [#allocation5]  }
  0xf6   :  { %185 = dma.done.wait [#allocation5], 16  }
  0xf7   :  { %186 = vsyncadd [#allocation5], 4294967280 }
  0xf8   :  { %125 = vsyncpa [#allocation4], 1 }
  0xf9   :  { %126 = vsyncpa [#allocation5], 1 }

</bundles_post_ra>
